<compile_context>
chip_gen: v7x
topology: tpu7x:2x2x1
jax: 0.10.0
libtpu: 0.0.40
codegen_flags: <defaults>
</compile_context>

<pallas_src>
import functools

import jax
import jax.numpy as jnp
from jax.experimental import pallas as pl
from jax.experimental.pallas import tpu as pltpu

VMEM = pltpu.MemorySpace.VMEM


# ----------------------------- fused Pallas kernel -----------------------------

def _fused_gat_kernel(nodes_ref, adj_ref, w_ref, a1_ref, a2_ref, wgc_ref, bgc_ref,
                      hmask_ref, gmask_ref, wo_ref, a1o_ref, a2o_ref, wgco_ref,
                      bgco_ref, out_ref, *, n_heads, n_orders, alpha):
    x = nodes_ref[...]                                        # (N, F_in)
    adj = (adj_ref[...] != 0).astype(jnp.float32)             # adj[adj != 0] = 1

    def row_l1_normalize(m):
        norm = jnp.maximum(jnp.sum(jnp.abs(m), axis=1, keepdims=True), 1e-12)
        return m / norm

    # higher-order adjacency matrices; masks and L1 normalization computed once
    # per order and reused by every head sharing that order.
    adj_pows = [adj]
    nth = adj
    for _ in range(n_orders):
        nth = jnp.dot(nth, adj, preferred_element_type=jnp.float32)
        adj_pows.append(nth)
    adj_norms = [row_l1_normalize(m) for m in adj_pows]
    adj_masks = [m > 0 for m in adj_pows]

    def masked_attention(s1, s2, mask, values):
        # e[i,j] = LeakyReLU(s1[i] + s2[j]); masked softmax over j; att @ values
        e = s1 + s2.T
        e = jnp.where(e >= 0, e, alpha * e)
        att = jnp.where(mask, e, jnp.full_like(e, -9.0e15))
        att = att - jnp.max(att, axis=1, keepdims=True)
        p = jnp.exp(att)
        att = p * pl.reciprocal(jnp.sum(p, axis=1, keepdims=True), approx=True)
        return jnp.dot(att, values, preferred_element_type=jnp.float32)

    # lane-dense stacked projections for all heads at once
    h_all = jnp.dot(x, w_ref[...], preferred_element_type=jnp.float32)      # (N, H*F)
    gc_proj = jnp.dot(x, wgc_ref[...], preferred_element_type=jnp.float32)  # (N, H*F)

    # multi-head attention stage: each head owns a disjoint lane block, so the
    # concat is a masked sum (no lane slicing, no per-head HBM traffic).
    xcat = jnp.zeros_like(h_all)
    for i in range(n_heads):
        g = i % (n_orders + 1)
        s1 = jnp.sum(h_all * a1_ref[i:i + 1, :], axis=1, keepdims=True)      # (N, 1)
        s2 = jnp.sum(h_all * a2_ref[i:i + 1, :], axis=1, keepdims=True)      # (N, 1)
        xcat = xcat + masked_attention(s1, s2, adj_masks[g],
                                       h_all * hmask_ref[i:i + 1, :])

    # graph-convolution branch, grouped by heads that share an adjacency matrix
    for g in range(n_orders + 1):
        xcat = xcat + jnp.dot(adj_norms[g], gc_proj * gmask_ref[g:g + 1, :],
                              preferred_element_type=jnp.float32)
    xcat = xcat + bgc_ref[...]

    # ELU (eval-mode Dropout == identity)
    xe = jnp.where(xcat > 0, xcat, jnp.exp(xcat) - 1.0)

    # output GAT layer on the binarized (unnormalized) adjacency
    h_o = jnp.dot(xe, wo_ref[...], preferred_element_type=jnp.float32)       # (N, C)
    s1o = jnp.sum(h_o * a1o_ref[...], axis=1, keepdims=True)
    s2o = jnp.sum(h_o * a2o_ref[...], axis=1, keepdims=True)
    hp_o = masked_attention(s1o, s2o, adj_masks[0], h_o)
    gc_o = jnp.dot(adj, jnp.dot(xe, wgco_ref[...], preferred_element_type=jnp.float32),
                   preferred_element_type=jnp.float32)
    out_ref[...] = hp_o + gc_o + bgco_ref[...]


# ----------------------------- wrapper -----------------------------

def gat_network_forward(packed, nodes, adj, idx, *, n_heads, n_orders, alpha, n_class):
    n = nodes.shape[0]
    kernel = functools.partial(_fused_gat_kernel, n_heads=n_heads,
                               n_orders=n_orders, alpha=alpha)
    out_full = pl.pallas_call(
        kernel,
        out_shape=jax.ShapeDtypeStruct((n, n_class), jnp.float32),
        in_specs=[pl.BlockSpec(memory_space=VMEM)] * 14,
        out_specs=pl.BlockSpec(memory_space=VMEM),
    )(nodes, adj,
      packed["W_stk"], packed["a1_rows"], packed["a2_rows"],
      packed["Wgc_stk"], packed["bgc_stk"],
      packed["head_mask"], packed["group_mask"],
      packed["W_out"], packed["a1_out"], packed["a2_out"],
      packed["Wgc_out"], packed["bgc_out"])
    return out_full[idx]      # eval-mode gather (done in XLA, negligible)


# ----------------------------- parameters -----------------------------

def _xavier_uniform(key, shape, gain=1.414):
    fan_out, fan_in = shape[0], shape[1]
    limit = gain * (6.0 / (fan_in + fan_out)) ** 0.5
    return jax.random.uniform(key, shape, jnp.float32, -limit, limit)


def make_layer_params(key, in_features, out_features):
    k_w, k_a, k_gc = jax.random.split(key, 3)
    a = _xavier_uniform(k_a, (2 * out_features, 1))
    return {
        "W": _xavier_uniform(k_w, (in_features, out_features)),
        "a1": a[:out_features, :],            # (F_out, 1)
        "a2": a[out_features:, :],            # (F_out, 1)
        "W_gc": _xavier_uniform(k_gc, (in_features, out_features)),
        "b_gc": jnp.zeros((1, out_features), jnp.float32),
    }


def make_network_params(key, n_feat, n_hid, n_class, n_heads):
    keys = jax.random.split(key, n_heads + 1)
    return {
        "attentions": [make_layer_params(keys[i], n_feat, n_hid) for i in range(n_heads)],
        "out_att": make_layer_params(keys[-1], n_hid * n_heads, n_class),
    }


def pack_params(params, *, n_heads, n_orders, n_hid):
    """Stack per-head parameters so every in-kernel matmul is lane-dense."""
    hw = n_heads * n_hid
    heads = params["attentions"]

    W_stk = jnp.concatenate([h["W"] for h in heads], axis=1)        # (F_in, H*F)
    Wgc_stk = jnp.concatenate([h["W_gc"] for h in heads], axis=1)   # (F_in, H*F)
    bgc_stk = jnp.concatenate([h["b_gc"] for h in heads], axis=1)   # (1, H*F)

    def place_row(vec, i):
        blocks = [jnp.zeros((n_hid,), jnp.float32)] * n_heads
        blocks[i] = vec
        return jnp.concatenate(blocks)

    a1_rows = jnp.stack([place_row(heads[i]["a1"][:, 0], i) for i in range(n_heads)])
    a2_rows = jnp.stack([place_row(heads[i]["a2"][:, 0], i) for i in range(n_heads)])
    head_mask = jnp.stack([place_row(jnp.ones((n_hid,), jnp.float32), i)
                           for i in range(n_heads)])
    group_mask = jnp.stack([
        sum((head_mask[i] for i in range(n_heads) if i % (n_orders + 1) == g),
            jnp.zeros((hw,), jnp.float32))
        for g in range(n_orders + 1)])

    out = params["out_att"]
    return {
        "W_stk": W_stk, "a1_rows": a1_rows, "a2_rows": a2_rows,
        "Wgc_stk": Wgc_stk, "bgc_stk": bgc_stk,
        "head_mask": head_mask, "group_mask": group_mask,
        "W_out": out["W"],                # (H*F, C)
        "a1_out": out["a1"].T,            # (1, C)
        "a2_out": out["a2"].T,            # (1, C)
        "Wgc_out": out["W_gc"],           # (H*F, C)
        "bgc_out": out["b_gc"],           # (1, C)
    }


# ----------------------------- pure-JAX reference (mirrors the PyTorch module) -----

def _gat_layer_ref(p, x, adj, alpha):
    h = x @ p["W"]
    e = h @ p["a1"] + (h @ p["a2"]).T
    e = jnp.where(e >= 0, e, alpha * e)
    att = jnp.where(adj > 0, e, -9.0e15)
    att = jax.nn.softmax(att, axis=1)
    hp = att @ h
    gc = adj @ (x @ p["W_gc"]) + p["b_gc"]
    return hp + gc


def gat_network_ref(params, nodes, adj, idx, *, n_heads, n_orders, alpha):
    adj = (adj != 0).astype(jnp.float32)

    def l1n(m):
        return m / jnp.maximum(jnp.sum(jnp.abs(m), axis=1, keepdims=True), 1e-12)

    mats = [l1n(adj)]
    nth = adj
    for _ in range(n_orders):
        nth = nth @ adj
        mats.append(l1n(nth))
    outs = [_gat_layer_ref(params["attentions"][i], nodes,
                           mats[i % (n_orders + 1)], alpha)
            for i in range(n_heads)]
    x = jnp.concatenate(outs, axis=1)
    x = jnp.where(x > 0, x, jnp.exp(x) - 1.0)   # ELU
    x = _gat_layer_ref(params["out_att"], x, adj, alpha)
    return x[idx]


# ----------------------------- main -----------------------------

if __name__ == "__main__":
    N_NODES = 8
    N_FEAT = 16
    N_HID = 8
    N_CLASS = 4
    N_HEADS = 4
    N_ORDERS = 2
    ALPHA = 0.2

    key = jax.random.PRNGKey(0)
    k_param, k_nodes, k_adj = jax.random.split(key, 3)

    params = make_network_params(k_param, N_FEAT, N_HID, N_CLASS, N_HEADS)
    packed = pack_params(params, n_heads=N_HEADS, n_orders=N_ORDERS, n_hid=N_HID)

    nodes = jax.random.normal(k_nodes, (N_NODES, N_FEAT), jnp.float32)
    adj = (jax.random.uniform(k_adj, (N_NODES, N_NODES)) < 0.4).astype(jnp.float32)
    adj = adj + jnp.eye(N_NODES, dtype=jnp.float32)   # self loops; binarized in-kernel
    idx = jnp.array([0, 2, 5, 7], dtype=jnp.int32)

    fwd = jax.jit(
        functools.partial(
            gat_network_forward,
            n_heads=N_HEADS, n_orders=N_ORDERS, alpha=ALPHA, n_class=N_CLASS,
        )
    )
    out = fwd(packed, nodes, adj, idx)
    out = jax.block_until_ready(out)

    ref = gat_network_ref(params, nodes, adj, idx,
                          n_heads=N_HEADS, n_orders=N_ORDERS, alpha=ALPHA)

    assert out.shape == (idx.shape[0], N_CLASS)
    assert bool(jnp.all(jnp.isfinite(out)))
    assert bool(jnp.allclose(out, ref, rtol=2e-2, atol=2e-2)), (
        f"max abs err {float(jnp.max(jnp.abs(out - ref)))}")
    print("KERNEL_OK")
</pallas_src>

<mosaic_0001>
module attributes {stable_mosaic.version = 11 : i64} {
  func.func @_fused_gat_kernel(%arg0: memref<8x16xf32, #tpu.memory_space<vmem>>, %arg1: memref<8x8xf32, #tpu.memory_space<vmem>>, %arg2: memref<16x32xf32, #tpu.memory_space<vmem>>, %arg3: memref<4x32xf32, #tpu.memory_space<vmem>>, %arg4: memref<4x32xf32, #tpu.memory_space<vmem>>, %arg5: memref<16x32xf32, #tpu.memory_space<vmem>>, %arg6: memref<1x32xf32, #tpu.memory_space<vmem>>, %arg7: memref<4x32xf32, #tpu.memory_space<vmem>>, %arg8: memref<3x32xf32, #tpu.memory_space<vmem>>, %arg9: memref<32x4xf32, #tpu.memory_space<vmem>>, %arg10: memref<1x4xf32, #tpu.memory_space<vmem>>, %arg11: memref<1x4xf32, #tpu.memory_space<vmem>>, %arg12: memref<32x4xf32, #tpu.memory_space<vmem>>, %arg13: memref<1x4xf32, #tpu.memory_space<vmem>>, %arg14: memref<8x4xf32, #tpu.memory_space<vmem>>) attributes {dimension_semantics = [], scalar_prefetch = 0 : i64, scratch_operands = 0 : i64, tpu.core_type = #tpu.core_type<tc>} {
    %c0 = arith.constant 0 : index
    %c0_0 = arith.constant 0 : index
    %0 = vector.load %arg0[%c0, %c0_0] : memref<8x16xf32, #tpu.memory_space<vmem>>, vector<8x16xf32>
    %c0_1 = arith.constant 0 : index
    %c0_2 = arith.constant 0 : index
    %1 = vector.load %arg1[%c0_1, %c0_2] : memref<8x8xf32, #tpu.memory_space<vmem>>, vector<8x8xf32>
    %cst = arith.constant 0.000000e+00 : f32
    %2 = vector.broadcast %cst : f32 to vector<8x8xf32>
    %3 = arith.cmpf one, %1, %2 : vector<8x8xf32>
    %4 = arith.extui %3 : vector<8x8xi1> to vector<8x8xi32>
    %5 = arith.sitofp %4 : vector<8x8xi32> to vector<8x8xf32>
    %cst_3 = arith.constant dense<0.000000e+00> : vector<8x8xf32>
    %6 = tpu.matmul %5, %5, %cst_3 {dimension_numbers = #tpu.dot_dimension_numbers<[1], [0], [0], [1], [0, 0, 1, 1], [], []>} : vector<8x8xf32>, vector<8x8xf32>, vector<8x8xf32> -> vector<8x8xf32>
    %cst_4 = arith.constant dense<0.000000e+00> : vector<8x8xf32>
    %7 = tpu.matmul %6, %5, %cst_4 {dimension_numbers = #tpu.dot_dimension_numbers<[1], [0], [0], [1], [0, 0, 1, 1], [], []>} : vector<8x8xf32>, vector<8x8xf32>, vector<8x8xf32> -> vector<8x8xf32>
    %8 = math.absf %5 : vector<8x8xf32>
    %cst_5 = arith.constant dense<0.000000e+00> : vector<8xf32>
    %9 = vector.multi_reduction <add>, %8, %cst_5 [1] : vector<8x8xf32> to vector<8xf32>
    %10 = vector.shape_cast %9 : vector<8xf32> to vector<8x1xf32>
    %cst_6 = arith.constant 9.99999996E-13 : f32
    %11 = vector.broadcast %cst_6 : f32 to vector<8x1xf32>
    %12 = arith.maximumf %10, %11 : vector<8x1xf32>
    %13 = vector.broadcast %12 : vector<8x1xf32> to vector<8x8xf32>
    %14 = arith.divf %5, %13 : vector<8x8xf32>
    %15 = math.absf %6 : vector<8x8xf32>
    %cst_7 = arith.constant dense<0.000000e+00> : vector<8xf32>
    %16 = vector.multi_reduction <add>, %15, %cst_7 [1] : vector<8x8xf32> to vector<8xf32>
    %17 = vector.shape_cast %16 : vector<8xf32> to vector<8x1xf32>
    %cst_8 = arith.constant 9.99999996E-13 : f32
    %18 = vector.broadcast %cst_8 : f32 to vector<8x1xf32>
    %19 = arith.maximumf %17, %18 : vector<8x1xf32>
    %20 = vector.broadcast %19 : vector<8x1xf32> to vector<8x8xf32>
    %21 = arith.divf %6, %20 : vector<8x8xf32>
    %22 = math.absf %7 : vector<8x8xf32>
    %cst_9 = arith.constant dense<0.000000e+00> : vector<8xf32>
    %23 = vector.multi_reduction <add>, %22, %cst_9 [1] : vector<8x8xf32> to vector<8xf32>
    %24 = vector.shape_cast %23 : vector<8xf32> to vector<8x1xf32>
    %cst_10 = arith.constant 9.99999996E-13 : f32
    %25 = vector.broadcast %cst_10 : f32 to vector<8x1xf32>
    %26 = arith.maximumf %24, %25 : vector<8x1xf32>
    %27 = vector.broadcast %26 : vector<8x1xf32> to vector<8x8xf32>
    %28 = arith.divf %7, %27 : vector<8x8xf32>
    %cst_11 = arith.constant 0.000000e+00 : f32
    %29 = vector.broadcast %cst_11 : f32 to vector<8x8xf32>
    %30 = arith.cmpf ogt, %5, %29 : vector<8x8xf32>
    %cst_12 = arith.constant 0.000000e+00 : f32
    %31 = vector.broadcast %cst_12 : f32 to vector<8x8xf32>
    %32 = arith.cmpf ogt, %6, %31 : vector<8x8xf32>
    %cst_13 = arith.constant 0.000000e+00 : f32
    %33 = vector.broadcast %cst_13 : f32 to vector<8x8xf32>
    %34 = arith.cmpf ogt, %7, %33 : vector<8x8xf32>
    %c0_14 = arith.constant 0 : index
    %c0_15 = arith.constant 0 : index
    %35 = vector.load %arg2[%c0_14, %c0_15] : memref<16x32xf32, #tpu.memory_space<vmem>>, vector<16x32xf32>
    %cst_16 = arith.constant dense<0.000000e+00> : vector<8x32xf32>
    %36 = tpu.matmul %0, %35, %cst_16 {dimension_numbers = #tpu.dot_dimension_numbers<[1], [0], [0], [1], [0, 0, 1, 1], [], []>} : vector<8x16xf32>, vector<16x32xf32>, vector<8x32xf32> -> vector<8x32xf32>
    %c0_17 = arith.constant 0 : index
    %c0_18 = arith.constant 0 : index
    %37 = vector.load %arg5[%c0_17, %c0_18] : memref<16x32xf32, #tpu.memory_space<vmem>>, vector<16x32xf32>
    %cst_19 = arith.constant dense<0.000000e+00> : vector<8x32xf32>
    %38 = tpu.matmul %0, %37, %cst_19 {dimension_numbers = #tpu.dot_dimension_numbers<[1], [0], [0], [1], [0, 0, 1, 1], [], []>} : vector<8x16xf32>, vector<16x32xf32>, vector<8x32xf32> -> vector<8x32xf32>
    %cst_20 = arith.constant 0.000000e+00 : f32
    %39 = vector.broadcast %cst_20 : f32 to vector<8x32xf32>
    %c0_21 = arith.constant 0 : index
    %c0_22 = arith.constant 0 : index
    %40 = vector.load %arg3[%c0_21, %c0_22] : memref<4x32xf32, #tpu.memory_space<vmem>>, vector<1x32xf32>
    %41 = vector.broadcast %40 : vector<1x32xf32> to vector<8x32xf32>
    %42 = arith.mulf %36, %41 : vector<8x32xf32>
    %cst_23 = arith.constant dense<0.000000e+00> : vector<8xf32>
    %43 = vector.multi_reduction <add>, %42, %cst_23 [1] : vector<8x32xf32> to vector<8xf32>
    %44 = vector.shape_cast %43 : vector<8xf32> to vector<8x1xf32>
    %c0_24 = arith.constant 0 : index
    %c0_25 = arith.constant 0 : index
    %45 = vector.load %arg4[%c0_24, %c0_25] : memref<4x32xf32, #tpu.memory_space<vmem>>, vector<1x32xf32>
    %46 = vector.broadcast %45 : vector<1x32xf32> to vector<8x32xf32>
    %47 = arith.mulf %36, %46 : vector<8x32xf32>
    %cst_26 = arith.constant dense<0.000000e+00> : vector<8xf32>
    %48 = vector.multi_reduction <add>, %47, %cst_26 [1] : vector<8x32xf32> to vector<8xf32>
    %49 = vector.shape_cast %48 : vector<8xf32> to vector<8x1xf32>
    %c0_27 = arith.constant 0 : index
    %c0_28 = arith.constant 0 : index
    %50 = vector.load %arg7[%c0_27, %c0_28] : memref<4x32xf32, #tpu.memory_space<vmem>>, vector<1x32xf32>
    %51 = vector.broadcast %50 : vector<1x32xf32> to vector<8x32xf32>
    %52 = arith.mulf %36, %51 : vector<8x32xf32>
    %53 = tpu.transpose %49, [1, 0] : vector<8x1xf32> -> vector<1x8xf32>
    %54 = vector.broadcast %44 : vector<8x1xf32> to vector<8x8xf32>
    %55 = vector.broadcast %53 : vector<1x8xf32> to vector<8x8xf32>
    %56 = arith.addf %54, %55 : vector<8x8xf32>
    %cst_29 = arith.constant 0.000000e+00 : f32
    %57 = vector.broadcast %cst_29 : f32 to vector<8x8xf32>
    %58 = arith.cmpf oge, %56, %57 : vector<8x8xf32>
    %cst_30 = arith.constant 2.000000e-01 : f32
    %59 = vector.broadcast %cst_30 : f32 to vector<8x8xf32>
    %60 = arith.mulf %59, %56 : vector<8x8xf32>
    %61 = arith.select %58, %56, %60 : vector<8x8xi1>, vector<8x8xf32>
    %cst_31 = arith.constant -9.000000e+15 : f32
    %62 = vector.broadcast %cst_31 : f32 to vector<8x8xf32>
    %63 = arith.select %30, %61, %62 : vector<8x8xi1>, vector<8x8xf32>
    %cst_32 = arith.constant dense<0xFF800000> : vector<8xf32>
    %64 = vector.multi_reduction <maximumf>, %63, %cst_32 [1] : vector<8x8xf32> to vector<8xf32>
    %65 = vector.shape_cast %64 : vector<8xf32> to vector<8x1xf32>
    %66 = vector.broadcast %65 : vector<8x1xf32> to vector<8x8xf32>
    %67 = arith.subf %63, %66 : vector<8x8xf32>
    %68 = math.exp %67 : vector<8x8xf32>
    %cst_33 = arith.constant dense<0.000000e+00> : vector<8xf32>
    %69 = vector.multi_reduction <add>, %68, %cst_33 [1] : vector<8x8xf32> to vector<8xf32>
    %70 = vector.shape_cast %69 : vector<8xf32> to vector<8x1xf32>
    %71 = tpu.reciprocal %70 {approx = true} : vector<8x1xf32> -> vector<8x1xf32>
    %72 = vector.broadcast %71 : vector<8x1xf32> to vector<8x8xf32>
    %73 = arith.mulf %68, %72 : vector<8x8xf32>
    %cst_34 = arith.constant dense<0.000000e+00> : vector<8x32xf32>
    %74 = tpu.matmul %73, %52, %cst_34 {dimension_numbers = #tpu.dot_dimension_numbers<[1], [0], [0], [1], [0, 0, 1, 1], [], []>} : vector<8x8xf32>, vector<8x32xf32>, vector<8x32xf32> -> vector<8x32xf32>
    %75 = arith.addf %39, %74 : vector<8x32xf32>
    %c1 = arith.constant 1 : index
    %c0_35 = arith.constant 0 : index
    %76 = vector.load %arg3[%c1, %c0_35] : memref<4x32xf32, #tpu.memory_space<vmem>>, vector<1x32xf32>
    %77 = vector.broadcast %76 : vector<1x32xf32> to vector<8x32xf32>
    %78 = arith.mulf %36, %77 : vector<8x32xf32>
    %cst_36 = arith.constant dense<0.000000e+00> : vector<8xf32>
    %79 = vector.multi_reduction <add>, %78, %cst_36 [1] : vector<8x32xf32> to vector<8xf32>
    %80 = vector.shape_cast %79 : vector<8xf32> to vector<8x1xf32>
    %c1_37 = arith.constant 1 : index
    %c0_38 = arith.constant 0 : index
    %81 = vector.load %arg4[%c1_37, %c0_38] : memref<4x32xf32, #tpu.memory_space<vmem>>, vector<1x32xf32>
    %82 = vector.broadcast %81 : vector<1x32xf32> to vector<8x32xf32>
    %83 = arith.mulf %36, %82 : vector<8x32xf32>
    %cst_39 = arith.constant dense<0.000000e+00> : vector<8xf32>
    %84 = vector.multi_reduction <add>, %83, %cst_39 [1] : vector<8x32xf32> to vector<8xf32>
    %85 = vector.shape_cast %84 : vector<8xf32> to vector<8x1xf32>
    %c1_40 = arith.constant 1 : index
    %c0_41 = arith.constant 0 : index
    %86 = vector.load %arg7[%c1_40, %c0_41] : memref<4x32xf32, #tpu.memory_space<vmem>>, vector<1x32xf32>
    %87 = vector.broadcast %86 : vector<1x32xf32> to vector<8x32xf32>
    %88 = arith.mulf %36, %87 : vector<8x32xf32>
    %89 = tpu.transpose %85, [1, 0] : vector<8x1xf32> -> vector<1x8xf32>
    %90 = vector.broadcast %80 : vector<8x1xf32> to vector<8x8xf32>
    %91 = vector.broadcast %89 : vector<1x8xf32> to vector<8x8xf32>
    %92 = arith.addf %90, %91 : vector<8x8xf32>
    %cst_42 = arith.constant 0.000000e+00 : f32
    %93 = vector.broadcast %cst_42 : f32 to vector<8x8xf32>
    %94 = arith.cmpf oge, %92, %93 : vector<8x8xf32>
    %cst_43 = arith.constant 2.000000e-01 : f32
    %95 = vector.broadcast %cst_43 : f32 to vector<8x8xf32>
    %96 = arith.mulf %95, %92 : vector<8x8xf32>
    %97 = arith.select %94, %92, %96 : vector<8x8xi1>, vector<8x8xf32>
    %cst_44 = arith.constant -9.000000e+15 : f32
    %98 = vector.broadcast %cst_44 : f32 to vector<8x8xf32>
    %99 = arith.select %32, %97, %98 : vector<8x8xi1>, vector<8x8xf32>
    %cst_45 = arith.constant dense<0xFF800000> : vector<8xf32>
    %100 = vector.multi_reduction <maximumf>, %99, %cst_45 [1] : vector<8x8xf32> to vector<8xf32>
    %101 = vector.shape_cast %100 : vector<8xf32> to vector<8x1xf32>
    %102 = vector.broadcast %101 : vector<8x1xf32> to vector<8x8xf32>
    %103 = arith.subf %99, %102 : vector<8x8xf32>
    %104 = math.exp %103 : vector<8x8xf32>
    %cst_46 = arith.constant dense<0.000000e+00> : vector<8xf32>
    %105 = vector.multi_reduction <add>, %104, %cst_46 [1] : vector<8x8xf32> to vector<8xf32>
    %106 = vector.shape_cast %105 : vector<8xf32> to vector<8x1xf32>
    %107 = tpu.reciprocal %106 {approx = true} : vector<8x1xf32> -> vector<8x1xf32>
    %108 = vector.broadcast %107 : vector<8x1xf32> to vector<8x8xf32>
    %109 = arith.mulf %104, %108 : vector<8x8xf32>
    %cst_47 = arith.constant dense<0.000000e+00> : vector<8x32xf32>
    %110 = tpu.matmul %109, %88, %cst_47 {dimension_numbers = #tpu.dot_dimension_numbers<[1], [0], [0], [1], [0, 0, 1, 1], [], []>} : vector<8x8xf32>, vector<8x32xf32>, vector<8x32xf32> -> vector<8x32xf32>
    %111 = arith.addf %75, %110 : vector<8x32xf32>
    %c2 = arith.constant 2 : index
    %c0_48 = arith.constant 0 : index
    %112 = vector.load %arg3[%c2, %c0_48] : memref<4x32xf32, #tpu.memory_space<vmem>>, vector<1x32xf32>
    %113 = vector.broadcast %112 : vector<1x32xf32> to vector<8x32xf32>
    %114 = arith.mulf %36, %113 : vector<8x32xf32>
    %cst_49 = arith.constant dense<0.000000e+00> : vector<8xf32>
    %115 = vector.multi_reduction <add>, %114, %cst_49 [1] : vector<8x32xf32> to vector<8xf32>
    %116 = vector.shape_cast %115 : vector<8xf32> to vector<8x1xf32>
    %c2_50 = arith.constant 2 : index
    %c0_51 = arith.constant 0 : index
    %117 = vector.load %arg4[%c2_50, %c0_51] : memref<4x32xf32, #tpu.memory_space<vmem>>, vector<1x32xf32>
    %118 = vector.broadcast %117 : vector<1x32xf32> to vector<8x32xf32>
    %119 = arith.mulf %36, %118 : vector<8x32xf32>
    %cst_52 = arith.constant dense<0.000000e+00> : vector<8xf32>
    %120 = vector.multi_reduction <add>, %119, %cst_52 [1] : vector<8x32xf32> to vector<8xf32>
    %121 = vector.shape_cast %120 : vector<8xf32> to vector<8x1xf32>
    %c2_53 = arith.constant 2 : index
    %c0_54 = arith.constant 0 : index
    %122 = vector.load %arg7[%c2_53, %c0_54] : memref<4x32xf32, #tpu.memory_space<vmem>>, vector<1x32xf32>
    %123 = vector.broadcast %122 : vector<1x32xf32> to vector<8x32xf32>
    %124 = arith.mulf %36, %123 : vector<8x32xf32>
    %125 = tpu.transpose %121, [1, 0] : vector<8x1xf32> -> vector<1x8xf32>
    %126 = vector.broadcast %116 : vector<8x1xf32> to vector<8x8xf32>
    %127 = vector.broadcast %125 : vector<1x8xf32> to vector<8x8xf32>
    %128 = arith.addf %126, %127 : vector<8x8xf32>
    %cst_55 = arith.constant 0.000000e+00 : f32
    %129 = vector.broadcast %cst_55 : f32 to vector<8x8xf32>
    %130 = arith.cmpf oge, %128, %129 : vector<8x8xf32>
    %cst_56 = arith.constant 2.000000e-01 : f32
    %131 = vector.broadcast %cst_56 : f32 to vector<8x8xf32>
    %132 = arith.mulf %131, %128 : vector<8x8xf32>
    %133 = arith.select %130, %128, %132 : vector<8x8xi1>, vector<8x8xf32>
    %cst_57 = arith.constant -9.000000e+15 : f32
    %134 = vector.broadcast %cst_57 : f32 to vector<8x8xf32>
    %135 = arith.select %34, %133, %134 : vector<8x8xi1>, vector<8x8xf32>
    %cst_58 = arith.constant dense<0xFF800000> : vector<8xf32>
    %136 = vector.multi_reduction <maximumf>, %135, %cst_58 [1] : vector<8x8xf32> to vector<8xf32>
    %137 = vector.shape_cast %136 : vector<8xf32> to vector<8x1xf32>
    %138 = vector.broadcast %137 : vector<8x1xf32> to vector<8x8xf32>
    %139 = arith.subf %135, %138 : vector<8x8xf32>
    %140 = math.exp %139 : vector<8x8xf32>
    %cst_59 = arith.constant dense<0.000000e+00> : vector<8xf32>
    %141 = vector.multi_reduction <add>, %140, %cst_59 [1] : vector<8x8xf32> to vector<8xf32>
    %142 = vector.shape_cast %141 : vector<8xf32> to vector<8x1xf32>
    %143 = tpu.reciprocal %142 {approx = true} : vector<8x1xf32> -> vector<8x1xf32>
    %144 = vector.broadcast %143 : vector<8x1xf32> to vector<8x8xf32>
    %145 = arith.mulf %140, %144 : vector<8x8xf32>
    %cst_60 = arith.constant dense<0.000000e+00> : vector<8x32xf32>
    %146 = tpu.matmul %145, %124, %cst_60 {dimension_numbers = #tpu.dot_dimension_numbers<[1], [0], [0], [1], [0, 0, 1, 1], [], []>} : vector<8x8xf32>, vector<8x32xf32>, vector<8x32xf32> -> vector<8x32xf32>
    %147 = arith.addf %111, %146 : vector<8x32xf32>
    %c3 = arith.constant 3 : index
    %c0_61 = arith.constant 0 : index
    %148 = vector.load %arg3[%c3, %c0_61] : memref<4x32xf32, #tpu.memory_space<vmem>>, vector<1x32xf32>
    %149 = vector.broadcast %148 : vector<1x32xf32> to vector<8x32xf32>
    %150 = arith.mulf %36, %149 : vector<8x32xf32>
    %cst_62 = arith.constant dense<0.000000e+00> : vector<8xf32>
    %151 = vector.multi_reduction <add>, %150, %cst_62 [1] : vector<8x32xf32> to vector<8xf32>
    %152 = vector.shape_cast %151 : vector<8xf32> to vector<8x1xf32>
    %c3_63 = arith.constant 3 : index
    %c0_64 = arith.constant 0 : index
    %153 = vector.load %arg4[%c3_63, %c0_64] : memref<4x32xf32, #tpu.memory_space<vmem>>, vector<1x32xf32>
    %154 = vector.broadcast %153 : vector<1x32xf32> to vector<8x32xf32>
    %155 = arith.mulf %36, %154 : vector<8x32xf32>
    %cst_65 = arith.constant dense<0.000000e+00> : vector<8xf32>
    %156 = vector.multi_reduction <add>, %155, %cst_65 [1] : vector<8x32xf32> to vector<8xf32>
    %157 = vector.shape_cast %156 : vector<8xf32> to vector<8x1xf32>
    %c3_66 = arith.constant 3 : index
    %c0_67 = arith.constant 0 : index
    %158 = vector.load %arg7[%c3_66, %c0_67] : memref<4x32xf32, #tpu.memory_space<vmem>>, vector<1x32xf32>
    %159 = vector.broadcast %158 : vector<1x32xf32> to vector<8x32xf32>
    %160 = arith.mulf %36, %159 : vector<8x32xf32>
    %161 = tpu.transpose %157, [1, 0] : vector<8x1xf32> -> vector<1x8xf32>
    %162 = vector.broadcast %152 : vector<8x1xf32> to vector<8x8xf32>
    %163 = vector.broadcast %161 : vector<1x8xf32> to vector<8x8xf32>
    %164 = arith.addf %162, %163 : vector<8x8xf32>
    %cst_68 = arith.constant 0.000000e+00 : f32
    %165 = vector.broadcast %cst_68 : f32 to vector<8x8xf32>
    %166 = arith.cmpf oge, %164, %165 : vector<8x8xf32>
    %cst_69 = arith.constant 2.000000e-01 : f32
    %167 = vector.broadcast %cst_69 : f32 to vector<8x8xf32>
    %168 = arith.mulf %167, %164 : vector<8x8xf32>
    %169 = arith.select %166, %164, %168 : vector<8x8xi1>, vector<8x8xf32>
    %cst_70 = arith.constant -9.000000e+15 : f32
    %170 = vector.broadcast %cst_70 : f32 to vector<8x8xf32>
    %171 = arith.select %30, %169, %170 : vector<8x8xi1>, vector<8x8xf32>
    %cst_71 = arith.constant dense<0xFF800000> : vector<8xf32>
    %172 = vector.multi_reduction <maximumf>, %171, %cst_71 [1] : vector<8x8xf32> to vector<8xf32>
    %173 = vector.shape_cast %172 : vector<8xf32> to vector<8x1xf32>
    %174 = vector.broadcast %173 : vector<8x1xf32> to vector<8x8xf32>
    %175 = arith.subf %171, %174 : vector<8x8xf32>
    %176 = math.exp %175 : vector<8x8xf32>
    %cst_72 = arith.constant dense<0.000000e+00> : vector<8xf32>
    %177 = vector.multi_reduction <add>, %176, %cst_72 [1] : vector<8x8xf32> to vector<8xf32>
    %178 = vector.shape_cast %177 : vector<8xf32> to vector<8x1xf32>
    %179 = tpu.reciprocal %178 {approx = true} : vector<8x1xf32> -> vector<8x1xf32>
    %180 = vector.broadcast %179 : vector<8x1xf32> to vector<8x8xf32>
    %181 = arith.mulf %176, %180 : vector<8x8xf32>
    %cst_73 = arith.constant dense<0.000000e+00> : vector<8x32xf32>
    %182 = tpu.matmul %181, %160, %cst_73 {dimension_numbers = #tpu.dot_dimension_numbers<[1], [0], [0], [1], [0, 0, 1, 1], [], []>} : vector<8x8xf32>, vector<8x32xf32>, vector<8x32xf32> -> vector<8x32xf32>
    %183 = arith.addf %147, %182 : vector<8x32xf32>
    %c0_74 = arith.constant 0 : index
    %c0_75 = arith.constant 0 : index
    %184 = vector.load %arg8[%c0_74, %c0_75] : memref<3x32xf32, #tpu.memory_space<vmem>>, vector<1x32xf32>
    %185 = vector.broadcast %184 : vector<1x32xf32> to vector<8x32xf32>
    %186 = arith.mulf %38, %185 : vector<8x32xf32>
    %cst_76 = arith.constant dense<0.000000e+00> : vector<8x32xf32>
    %187 = tpu.matmul %14, %186, %cst_76 {dimension_numbers = #tpu.dot_dimension_numbers<[1], [0], [0], [1], [0, 0, 1, 1], [], []>} : vector<8x8xf32>, vector<8x32xf32>, vector<8x32xf32> -> vector<8x32xf32>
    %188 = arith.addf %183, %187 : vector<8x32xf32>
    %c1_77 = arith.constant 1 : index
    %c0_78 = arith.constant 0 : index
    %189 = vector.load %arg8[%c1_77, %c0_78] : memref<3x32xf32, #tpu.memory_space<vmem>>, vector<1x32xf32>
    %190 = vector.broadcast %189 : vector<1x32xf32> to vector<8x32xf32>
    %191 = arith.mulf %38, %190 : vector<8x32xf32>
    %cst_79 = arith.constant dense<0.000000e+00> : vector<8x32xf32>
    %192 = tpu.matmul %21, %191, %cst_79 {dimension_numbers = #tpu.dot_dimension_numbers<[1], [0], [0], [1], [0, 0, 1, 1], [], []>} : vector<8x8xf32>, vector<8x32xf32>, vector<8x32xf32> -> vector<8x32xf32>
    %193 = arith.addf %188, %192 : vector<8x32xf32>
    %c2_80 = arith.constant 2 : index
    %c0_81 = arith.constant 0 : index
    %194 = vector.load %arg8[%c2_80, %c0_81] : memref<3x32xf32, #tpu.memory_space<vmem>>, vector<1x32xf32>
    %195 = vector.broadcast %194 : vector<1x32xf32> to vector<8x32xf32>
    %196 = arith.mulf %38, %195 : vector<8x32xf32>
    %cst_82 = arith.constant dense<0.000000e+00> : vector<8x32xf32>
    %197 = tpu.matmul %28, %196, %cst_82 {dimension_numbers = #tpu.dot_dimension_numbers<[1], [0], [0], [1], [0, 0, 1, 1], [], []>} : vector<8x8xf32>, vector<8x32xf32>, vector<8x32xf32> -> vector<8x32xf32>
    %198 = arith.addf %193, %197 : vector<8x32xf32>
    %c0_83 = arith.constant 0 : index
    %c0_84 = arith.constant 0 : index
    %199 = vector.load %arg6[%c0_83, %c0_84] : memref<1x32xf32, #tpu.memory_space<vmem>>, vector<1x32xf32>
    %200 = vector.broadcast %199 : vector<1x32xf32> to vector<8x32xf32>
    %201 = arith.addf %198, %200 : vector<8x32xf32>
    %cst_85 = arith.constant 0.000000e+00 : f32
    %202 = vector.broadcast %cst_85 : f32 to vector<8x32xf32>
    %203 = arith.cmpf ogt, %201, %202 : vector<8x32xf32>
    %204 = math.exp %201 : vector<8x32xf32>
    %cst_86 = arith.constant 1.000000e+00 : f32
    %205 = vector.broadcast %cst_86 : f32 to vector<8x32xf32>
    %206 = arith.subf %204, %205 : vector<8x32xf32>
    %207 = arith.select %203, %201, %206 : vector<8x32xi1>, vector<8x32xf32>
    %c0_87 = arith.constant 0 : index
    %c0_88 = arith.constant 0 : index
    %208 = vector.load %arg9[%c0_87, %c0_88] : memref<32x4xf32, #tpu.memory_space<vmem>>, vector<32x4xf32>
    %cst_89 = arith.constant dense<0.000000e+00> : vector<8x4xf32>
    %209 = tpu.matmul %207, %208, %cst_89 {dimension_numbers = #tpu.dot_dimension_numbers<[1], [0], [0], [1], [0, 0, 1, 1], [], []>} : vector<8x32xf32>, vector<32x4xf32>, vector<8x4xf32> -> vector<8x4xf32>
    %c0_90 = arith.constant 0 : index
    %c0_91 = arith.constant 0 : index
    %210 = vector.load %arg10[%c0_90, %c0_91] : memref<1x4xf32, #tpu.memory_space<vmem>>, vector<1x4xf32>
    %211 = vector.broadcast %210 : vector<1x4xf32> to vector<8x4xf32>
    %212 = arith.mulf %209, %211 : vector<8x4xf32>
    %cst_92 = arith.constant dense<0.000000e+00> : vector<8xf32>
    %213 = vector.multi_reduction <add>, %212, %cst_92 [1] : vector<8x4xf32> to vector<8xf32>
    %214 = vector.shape_cast %213 : vector<8xf32> to vector<8x1xf32>
    %c0_93 = arith.constant 0 : index
    %c0_94 = arith.constant 0 : index
    %215 = vector.load %arg11[%c0_93, %c0_94] : memref<1x4xf32, #tpu.memory_space<vmem>>, vector<1x4xf32>
    %216 = vector.broadcast %215 : vector<1x4xf32> to vector<8x4xf32>
    %217 = arith.mulf %209, %216 : vector<8x4xf32>
    %cst_95 = arith.constant dense<0.000000e+00> : vector<8xf32>
    %218 = vector.multi_reduction <add>, %217, %cst_95 [1] : vector<8x4xf32> to vector<8xf32>
    %219 = vector.shape_cast %218 : vector<8xf32> to vector<8x1xf32>
    %220 = tpu.transpose %219, [1, 0] : vector<8x1xf32> -> vector<1x8xf32>
    %221 = vector.broadcast %214 : vector<8x1xf32> to vector<8x8xf32>
    %222 = vector.broadcast %220 : vector<1x8xf32> to vector<8x8xf32>
    %223 = arith.addf %221, %222 : vector<8x8xf32>
    %cst_96 = arith.constant 0.000000e+00 : f32
    %224 = vector.broadcast %cst_96 : f32 to vector<8x8xf32>
    %225 = arith.cmpf oge, %223, %224 : vector<8x8xf32>
    %cst_97 = arith.constant 2.000000e-01 : f32
    %226 = vector.broadcast %cst_97 : f32 to vector<8x8xf32>
    %227 = arith.mulf %226, %223 : vector<8x8xf32>
    %228 = arith.select %225, %223, %227 : vector<8x8xi1>, vector<8x8xf32>
    %cst_98 = arith.constant -9.000000e+15 : f32
    %229 = vector.broadcast %cst_98 : f32 to vector<8x8xf32>
    %230 = arith.select %30, %228, %229 : vector<8x8xi1>, vector<8x8xf32>
    %cst_99 = arith.constant dense<0xFF800000> : vector<8xf32>
    %231 = vector.multi_reduction <maximumf>, %230, %cst_99 [1] : vector<8x8xf32> to vector<8xf32>
    %232 = vector.shape_cast %231 : vector<8xf32> to vector<8x1xf32>
    %233 = vector.broadcast %232 : vector<8x1xf32> to vector<8x8xf32>
    %234 = arith.subf %230, %233 : vector<8x8xf32>
    %235 = math.exp %234 : vector<8x8xf32>
    %cst_100 = arith.constant dense<0.000000e+00> : vector<8xf32>
    %236 = vector.multi_reduction <add>, %235, %cst_100 [1] : vector<8x8xf32> to vector<8xf32>
    %237 = vector.shape_cast %236 : vector<8xf32> to vector<8x1xf32>
    %238 = tpu.reciprocal %237 {approx = true} : vector<8x1xf32> -> vector<8x1xf32>
    %239 = vector.broadcast %238 : vector<8x1xf32> to vector<8x8xf32>
    %240 = arith.mulf %235, %239 : vector<8x8xf32>
    %cst_101 = arith.constant dense<0.000000e+00> : vector<8x4xf32>
    %241 = tpu.matmul %240, %209, %cst_101 {dimension_numbers = #tpu.dot_dimension_numbers<[1], [0], [0], [1], [0, 0, 1, 1], [], []>} : vector<8x8xf32>, vector<8x4xf32>, vector<8x4xf32> -> vector<8x4xf32>
    %c0_102 = arith.constant 0 : index
    %c0_103 = arith.constant 0 : index
    %242 = vector.load %arg12[%c0_102, %c0_103] : memref<32x4xf32, #tpu.memory_space<vmem>>, vector<32x4xf32>
    %cst_104 = arith.constant dense<0.000000e+00> : vector<8x4xf32>
    %243 = tpu.matmul %207, %242, %cst_104 {dimension_numbers = #tpu.dot_dimension_numbers<[1], [0], [0], [1], [0, 0, 1, 1], [], []>} : vector<8x32xf32>, vector<32x4xf32>, vector<8x4xf32> -> vector<8x4xf32>
    %cst_105 = arith.constant dense<0.000000e+00> : vector<8x4xf32>
    %244 = tpu.matmul %5, %243, %cst_105 {dimension_numbers = #tpu.dot_dimension_numbers<[1], [0], [0], [1], [0, 0, 1, 1], [], []>} : vector<8x8xf32>, vector<8x4xf32>, vector<8x4xf32> -> vector<8x4xf32>
    %245 = arith.addf %241, %244 : vector<8x4xf32>
    %c0_106 = arith.constant 0 : index
    %c0_107 = arith.constant 0 : index
    %246 = vector.load %arg13[%c0_106, %c0_107] : memref<1x4xf32, #tpu.memory_space<vmem>>, vector<1x4xf32>
    %247 = vector.broadcast %246 : vector<1x4xf32> to vector<8x4xf32>
    %248 = arith.addf %245, %247 : vector<8x4xf32>
    %c0_108 = arith.constant 0 : index
    %c0_109 = arith.constant 0 : index
    %249 = vector.load %arg14[%c0_108, %c0_109] : memref<8x4xf32, #tpu.memory_space<vmem>>, vector<8x4xf32>
    tpu.vector_store %arg14[%c0_108, %c0_109], %248 {strides = array<i32>} : memref<8x4xf32, #tpu.memory_space<vmem>>, vector<8x4xf32>,
    return
  }
}

</mosaic_0001>

<bundles_post_ra>
// kernel: gat_network_forward.1
= control target key start
LH: loop header
LB: loop body
LE: loop exit
PB: predicated region body
PF: predicated region fallthrough
CT: control target
= control target key end

     0   :  { %v1822_v0 = vmov 0.0   ;;  %vm1823_vm0 = vmmov 0   ;;  %vm52_vm1 = vcmask 64512   ;;  %v1824_v6 = vmov 1.0   ;;  %s2127_s1 = inlined_call_operand.vmem [shape: f32[8,8], index: 1, kind: input, shape index: {}]   ;;  %s2128_s2 = inlined_call_operand.vmem [shape: f32[16,32], index: 2, kind: input, shape index: {}]   ;;  %s2129_s0 = inlined_call_operand.vmem [shape: f32[8,16], index: 0, kind: input, shape index: {}]   ;;  %s2130_s5 = inlined_call_operand.vmem [shape: f32[16,32], index: 5, kind: input, shape index: {}]   ;;  %s2131_s4 = inlined_call_operand.vmem [shape: f32[4,32], index: 4, kind: input, shape index: {}]   ;;  %s2132_s7 = inlined_call_operand.vmem [shape: f32[4,32], index: 7, kind: input, shape index: {}]   ;;  %s2133_s3 = inlined_call_operand.vmem [shape: f32[4,32], index: 3, kind: input, shape index: {}]   ;;  %s2134_s8 = inlined_call_operand.vmem [shape: f32[3,32], index: 8, kind: input, shape index: {}]   ;;  %s2135_s9 = inlined_call_operand.vmem [shape: f32[32,4], index: 9, kind: input, shape index: {}]   ;;  %s2136_s12 = inlined_call_operand.vmem [shape: f32[32,4], index: 12, kind: input, shape index: {}]   ;;  %s2137_s6 = inlined_call_operand.vmem [shape: f32[1,32], index: 6, kind: input, shape index: {}]   ;;  %s2138_s11 = inlined_call_operand.vmem [shape: f32[1,4], index: 11, kind: input, shape index: {}]   ;;  %s2139_s10 = inlined_call_operand.vmem [shape: f32[1,4], index: 10, kind: input, shape index: {}]   ;;  %s2140_s13 = inlined_call_operand.vmem [shape: f32[1,4], index: 13, kind: input, shape index: {}]   ;;  %s2141_s14 = inlined_call_operand.vmem [shape: f32[8,4], index: 14, kind: output, shape index: {}]  }
   0x1   :  { %1681 = vmatprep.subr.mxu0 %v1822_v0  ;;  %v48_v1 = vld [vmem:[%s2127_s1] sm:$0xff]  ;;  %1683 = vmatprep.mubr.msk.f32.mxu0 %vm1823_vm0, %v1822_v0  ;;  %v224_v3 = vld [vmem:[%s2128_s2 + $0x8] sm:$0xff]  ;;  %v1825_v7 = vmov 0.0|0.0   ;;  %vm225_vm3 = vcmask 130048   ;;  %vm377_vm4 = vcmask 261120   ;;  %v428_v54 = vlaneseq }
   0x2   :  { %v223_v2 = vld [vmem:[%s2128_s2] sm:$0xff]  ;;  %vm49_vm2 = vcmp.ne.f32.partialorder %v48_v1, 0.0  ;;  %1686 = vmatprep.subr.mxu1 %v1822_v0  ;;  %1688 = vmatprep.mubr.msk.f32.mxu1 %vm1823_vm0, %v1822_v0  ;;  %v300_v10 = vld [vmem:[%s2130_s5 + $0x8] sm:$0xff]  ;;  %vm1308_vm13 = vcmask 31744  }
   0x3   :  { %v1773_v4 = vpack.c.bf16 %v224_v3, %v223_v2  ;;  %v1917_v5 = vsel %vm49_vm2, 1.0, %v1822_v0  ;;  %1682 = vmatpush3.msk.msra.mxu0 %vm49_vm2, %v1824_v6  ;;  %1687 = vmatpush3.msk.msra.mxu1 %vm49_vm2, %v1824_v6  ;;  %v47_v8 = vld [vmem:[%s2129_s0] sm:$0xff]  ;;  %v429_v56 = vshrl.u32 %v428_v54, 7 }
   0x4   :  { %1684 = vmatmul.mubr.msk.f32.vlgmr.msra.gmra.mrb[0].mxu0 %vm52_vm1, %v1917_v5  ;;  %1772 = vmatprep.subr.bf16.mxu0 %v1825_v7  ;;  %v299_v9 = vld [vmem:[%s2130_s5] sm:$0xff]  ;;  %vm220_vm8 = vcmp.gt.f32.partialorder %v1917_v5, 0.0 }
   0x5   :  { %1774 = vmatpush3.bf16.msra.mxu0 %v1773_v4  ;;  %1695 = vmatprep.mubr.msk.f32.mxu0 %vm1823_vm0, %v1822_v0  ;;  %v1776_v11 = vpack.c.bf16 %v300_v10, %v299_v9  ;;  %v1621_v14 = vld [vmem:[%s2131_s4 + $0x2] ss:$0 sm:$0xff]  ;;  %v1617_v15 = vld [vmem:[%s2132_s7 + $0x1] ss:$0 sm:$0xff]  ;;  %v1614_v17 = vld [vmem:[%s2132_s7] ss:$0 sm:$0xff] }
   0x6   :  { %1775 = vmatprep.subr.bf16.mxu1 %v1825_v7  ;;  %1705 = vmatprep.subr.mxu0 %v1822_v0  ;;  %v1616_v16 = vld [vmem:[%s2131_s4 + $0x1] ss:$0 sm:$0xff]  ;;  %v1625_v19 = vld [vmem:[%s2131_s4 + $0x3] ss:$0 sm:$0xff]  ;;  %v1613_v20 = vld [vmem:[%s2131_s4] ss:$0 sm:$0xff] }
   0x7   :  { %v1622_v26 = vld [vmem:[%s2132_s7 + $0x2] ss:$0 sm:$0xff]  ;;  %v1626_v27 = vld [vmem:[%s2132_s7 + $0x3] ss:$0 sm:$0xff]  ;;  %v1615_v32 = vld [vmem:[%s2133_s3 + $0x1] ss:$0 sm:$0xff] }
   0x8   :  { %1696 = vmatmul.mubr.msk.f32.vlgmr.msra.gmra.mrb[2].mxu0 %vm225_vm3, %v47_v8  ;;  %v1612_v33 = vld [vmem:[%s2133_s3] ss:$0 sm:$0xff]  ;;  %v1620_v40 = vld [vmem:[%s2133_s3 + $0x2] ss:$0 sm:$0xff]  ;;  %v1624_v41 = vld [vmem:[%s2133_s3 + $0x3] ss:$0 sm:$0xff] }
   0x9   :  { %1707 = vmatprep.mubr.msk.f32.mxu0 %vm1823_vm0, %v1822_v0  ;;  %v2000_v59 = vsub.s32 0, %v429_v56 }
  0xd7   :  { %v1938_v12 = vpop.f32.mrb[0].mxu0 }
  0xd8   :  { %v1685_v13 = vpop.f32.mrb[1].mxu0  ;;  %1689 = vmatmul.mubr.msk.f32.vlgmr.msra.gmra.mrb[0].mxu1 %vm52_vm1, %v1938_v12  ;;  %vm221_vm6 = vcmp.gt.f32.partialorder %v1938_v12, 0.0 }
  0xd9   :  { %1777 = vmatpush3.bf16.msra.mxu1 %v1776_v11  ;;  %1702 = vmatprep.mubr.msk.f32.mxu1 %vm1823_vm0, %v1822_v0 }
  0xda   :  { %1710 = vmatprep.subr.mxu1 %v1822_v0 }
  0xdb   :  { %v295_v18 = vpop.f32.mrb[2].mxu0 }
  0xdc   :  { %v1697_v21 = vpop.f32.mrb[3].mxu0  ;;  %1703 = vmatmul.mubr.msk.f32.vlgmr.msra.gmra.mrb[2].mxu1 %vm225_vm3, %v47_v8  ;;  %v684_v22 = vmul.f32 %v1621_v14, %v295_v18  ;;  %v471_v23 = vmul.f32 %v1617_v15, %v295_v18  ;;  %v462_v24 = vmul.f32 %v1616_v16, %v295_v18  ;;  %v395_v25 = vmul.f32 %v1614_v17, %v295_v18 }
  0xdd   :  { %1712 = vmatprep.mubr.msk.f32.mxu1 %vm1823_vm0, %v1822_v0  ;;  %v834_v30 = vmul.f32 %v1625_v19, %v295_v18  ;;  %v386_v31 = vmul.f32 %v1613_v20, %v295_v18  ;;  %v1981_v34 = vmul.f32 %v1622_v26, %v295_v18  ;;  %v1984_v35 = vmul.f32 %v1626_v27, %v295_v18 }
  0xde   :  { %v685_v28 = vsel %vm377_vm4, %v684_v22, 0.0  ;;  %1706 = vmatpush3.msra.mxu0 %v471_v23  ;;  %v463_v29 = vsel %vm377_vm4, %v462_v24, 0.0  ;;  %1711 = vmatpush3.msra.mxu1 %v395_v25  ;;  %v453_v38 = vmul.f32 %v1615_v32, %v295_v18  ;;  %v376_v39 = vmul.f32 %v1612_v33, %v295_v18 }
  0xdf   :  { %686 = vadd.xlane.f32.xlu1 %v685_v28  ;;  %464 = vadd.xlane.f32.xlu0 %v463_v29  ;;  %v835_v36 = vsel %vm377_vm4, %v834_v30, 0.0  ;;  %v387_v37 = vsel %vm377_vm4, %v386_v31, 0.0  ;;  %v675_v44 = vmul.f32 %v1620_v40, %v295_v18  ;;  %v825_v45 = vmul.f32 %v1624_v41, %v295_v18 }
  0xe0   :  { %1715 = vmatprep.subr.mxu0 %v1822_v0  ;;  %1720 = vmatprep.subr.mxu1 %v1822_v0  ;;  %v454_v42 = vsel %vm377_vm4, %v453_v38, 0.0  ;;  %v378_v43 = vsel %vm377_vm4, %v376_v39, 0.0 }
  0xe1   :  { %v676_v46 = vsel %vm377_vm4, %v675_v44, 0.0  ;;  %v826_v47 = vsel %vm377_vm4, %v825_v45, 0.0 }
  0xe3   :  { %836 = vadd.xlane.f32.xlu1 %v835_v36  ;;  %388 = vadd.xlane.f32.xlu0 %v387_v37 }
  0xe7   :  { %455 = vadd.xlane.f32.xlu0 %v454_v42  ;;  %379 = vadd.xlane.f32.xlu1 %v378_v43 }
  0xeb   :  { %677 = vadd.xlane.f32.xlu0 %v676_v46  ;;  %827 = vadd.xlane.f32.xlu1 %v826_v47  ;;  %v199_v46 = vand.u32 2147483647, %v1917_v5 }
 0x16c   :  { %v465_v48 = vpop.xlane.xlu0 %464  ;;  %v687_v49 = vpop.xlane.xlu1 %686 }
 0x16d   :  { %472 = vxpose.xlu0.b32.start.end [1/1] (short) (narrow) %v465_v48, 8 }
 0x170   :  { %v389_v50 = vpop.xlane.xlu0 %388  ;;  %v837_v51 = vpop.xlane.xlu1 %836 }
 0x171   :  { %694 = vxpose.xlu0.b32.start.end [1/1] (short) (narrow) %v687_v49, 8  ;;  %396 = vxpose.xlu1.b32.start.end [1/1] (short) (narrow) %v389_v50, 8 }
 0x174   :  { %v456_v55 = vpop.xlane.xlu0 %455  ;;  %v380_v57 = vpop.xlane.xlu1 %379 }
 0x175   :  { %844 = vxpose.xlu0.b32.start.end [1/1] (short) (narrow) %v837_v51, 8  ;;  %v200_v51 = vsel %vm52_vm1, %v199_v46, 0.0 }
 0x178   :  { %v678_v58 = vpop.xlane.xlu0 %677  ;;  %v828_v60 = vpop.xlane.xlu1 %827 }
 0x1ab   :  { %v1998_v52 = vpop.f32.mrb[0].mxu1 }
 0x1ac   :  { %v1690_v53 = vpop.f32.mrb[1].mxu1  ;;  %vm222_vm10 = vcmp.gt.f32.partialorder %v1998_v52, 0.0  ;;  %v213_v54 = vand.u32 2147483647, %v1998_v52 }
 0x1ae   :  { %v214_v56 = vsel %vm52_vm1, %v213_v54, 0.0 }
 0x1ed   :  { %v488_v61 = vpop.trf.xlu0 }
 0x1ee   :  { %v507_v62 = vrot.slane %v488_v61, %v2000_v59 }
 0x1f0   :  { %v508_v63 = vadd.f32 %v507_v62, %v456_v55  ;;  %v206_v55 = vand.u32 2147483647, %v1938_v12 }
 0x1f1   :  { %v710_v1 = vpop.trf.xlu0  ;;  %v412_v2 = vpop.trf.xlu1 }
 0x1f2   :  { %v729_v3 = vrot.slane %v710_v1, %v2000_v59  ;;  %v431_v4 = vrot.slane %v412_v2, %v2000_v59  ;;  %vm509_vm5 = vcmp.ge.f32.partialorder %v508_v63, 0.0  ;;  %v510_v6 = vmul.f32 0.2, %v508_v63 }
 0x1f4   :  { %v730_v8 = vadd.f32 %v729_v3, %v678_v58  ;;  %v432_v9 = vadd.f32 %v431_v4, %v380_v57  ;;  %v511_v10 = vsel %vm509_vm5, %v508_v63, %v510_v6  ;;  %v207_v57 = vsel %vm52_vm1, %v206_v55, 0.0  ;;  %v367_v58 = vpop.f32.mrb[2].mxu1 }
 0x1f5   :  { %v860_v11 = vpop.trf.xlu0  ;;  %v512_v13 = vsel %vm221_vm6, %v511_v10, -9e+15 }
 0x1f6   :  { %v879_v14 = vrot.slane %v860_v11, %v2000_v59  ;;  %v513_v15 = vsel %vm52_vm1, %v512_v13, -inf  ;;  %vm731_vm7 = vcmp.ge.f32.partialorder %v730_v8, 0.0  ;;  %v732_v16 = vmul.f32 0.2, %v730_v8 }
 0x1f7   :  { %514 = vmax.xlane.f32.xlu1 %v513_v15  ;;  %vm433_vm9 = vcmp.ge.f32.partialorder %v432_v9, 0.0  ;;  %v434_v17 = vmul.f32 0.2, %v432_v9 }
 0x1f8   :  { %v880_v18 = vadd.f32 %v879_v14, %v828_v60  ;;  %v733_v19 = vsel %vm731_vm7, %v730_v8, %v732_v16  ;;  %v1704_v60 = vpop.f32.mrb[3].mxu1 }
 0x1f9   :  { %v734_v20 = vsel %vm222_vm10, %v733_v19, -9e+15  ;;  %v435_v21 = vsel %vm433_vm9, %v432_v9, %v434_v17  ;;  %v1628_v9 = vld [vmem:[%s2134_s8] ss:$0 sm:$0xff]  ;;  %v1630_v19 = vld [vmem:[%s2134_s8 + $0x1] ss:$0 sm:$0xff] }
 0x1fa   :  { %v735_v22 = vsel %vm52_vm1, %v734_v20, -inf  ;;  %v436_v23 = vsel %vm220_vm8, %v435_v21, -9e+15  ;;  %vm881_vm11 = vcmp.ge.f32.partialorder %v880_v18, 0.0  ;;  %v882_v24 = vmul.f32 0.2, %v880_v18 }
 0x1fb   :  { %736 = vmax.xlane.f32.xlu1 %v735_v22  ;;  %v437_v25 = vsel %vm52_vm1, %v436_v23, -inf  ;;  %v975_v15 = vmul.f32 %v1628_v9, %v367_v58  ;;  %v1055_v22 = vmul.f32 %v1630_v19, %v367_v58 }
 0x1fc   :  { %438 = vmax.xlane.f32.xlu0 %v437_v25  ;;  %v883_v26 = vsel %vm881_vm11, %v880_v18, %v882_v24 }
 0x1fd   :  { %v884_v27 = vsel %vm220_vm8, %v883_v26, -9e+15 }
 0x1fe   :  { %v885_v28 = vsel %vm52_vm1, %v884_v27, -inf }
 0x1ff   :  { %886 = vmax.xlane.f32.xlu1 %v885_v28 }
 0x284   :  { %v515_v29 = vpop.xlane.xlu1 %514 }
 0x285   :  { %v516_v30 = vsub.f32 %v512_v13, %v515_v29  ;;  %v1223_v29 = vld [vmem:[%s2135_s9] sm:$0xff] }
 0x287   :  { %v517_v31 = vmul.f32 1.442695, %v516_v30 }
 0x288   :  { %v737_v32 = vpop.xlane.xlu1 %736 }
 0x289   :  { %1794 = vpow2.f32 %v517_v31  ;;  %v439_v33 = vpop.xlane.xlu0 %438  ;;  %v738_v36 = vsub.f32 %v734_v20, %v737_v32  ;;  %v1376_v31 = vld [vmem:[%s2136_s12 + $0x8] sm:$0xff]  ;;  %v1225_v32 = vld [vmem:[%s2135_s9 + $0x10] sm:$0xff] }
 0x28a   :  { %v440_v37 = vsub.f32 %v436_v23, %v439_v33  ;;  %v1226_v33 = vld [vmem:[%s2135_s9 + $0x18] sm:$0xff] }
 0x28b   :  { %v739_v38 = vmul.f32 1.442695, %v738_v36 }
 0x28c   :  { %v441_v39 = vmul.f32 1.442695, %v440_v37  ;;  %v887_v40 = vpop.xlane.xlu1 %886  ;;  %v1377_v37 = vld [vmem:[%s2136_s12 + $0x10] sm:$0xff] }
 0x28d   :  { %1796 = vpow2.f32 %v739_v38  ;;  %v888_v41 = vsub.f32 %v884_v27, %v887_v40  ;;  %v1378_v38 = vld [vmem:[%s2136_s12 + $0x18] sm:$0xff] }
 0x28e   :  { %1798 = vpow2.f32 %v441_v39  ;;  %v1782_v39 = vpack.c.bf16 %v1226_v33, %v1225_v32  ;;  %v1788_v40 = vpack.c.bf16 %v1378_v38, %v1377_v37 }
 0x28f   :  { %v889_v42 = vmul.f32 1.442695, %v888_v41 }
 0x291   :  { %1800 = vpow2.f32 %v889_v42 }
 0x293   :  { %v1795_v43 = vpop.eup %1794 }
 0x294   :  { %v519_v44 = vsel %vm52_vm1, %v1795_v43, 0.0 }
 0x295   :  { %520 = vadd.xlane.f32.xlu0 %v519_v44 }
 0x297   :  { %v1797_v45 = vpop.eup %1796 }
 0x298   :  { %v1799_v47 = vpop.eup %1798  ;;  %v741_v48 = vsel %vm52_vm1, %v1797_v45, 0.0 }
 0x299   :  { %v443_v49 = vsel %vm52_vm1, %v1799_v47, 0.0  ;;  %742 = vadd.xlane.f32.xlu0 %v741_v48 }
 0x29a   :  { %444 = vadd.xlane.f32.xlu1 %v443_v49 }
 0x29b   :  { %v1801_v50 = vpop.eup %1800 }
 0x29c   :  { %v891_v53 = vsel %vm52_vm1, %v1801_v50, 0.0 }
 0x29d   :  { %892 = vadd.xlane.f32.xlu0 %v891_v53 }
 0x29e   :  { %201 = vadd.xlane.f32.xlu1 %v200_v51 }
 0x2a1   :  { %215 = vadd.xlane.f32.xlu0 %v214_v56 }
 0x2a2   :  { %208 = vadd.xlane.f32.xlu1 %v207_v57 }
 0x322   :  { %v521_v61 = vpop.xlane.xlu0 %520 }
 0x323   :  { %1802 = vrcp.f32 %v521_v61  ;;  %v1634_v61 = vld [vmem:[%s2137_s6] ss:$0 sm:$0xff] }
 0x326   :  { %v743_v62 = vpop.xlane.xlu0 %742 }
 0x327   :  { %1804 = vrcp.f32 %v743_v62  ;;  %v445_v63 = vpop.xlane.xlu1 %444 }
 0x328   :  { %1806 = vrcp.f32 %v445_v63 }
 0x32a   :  { %v893_v1 = vpop.xlane.xlu0 %892 }
 0x32b   :  { %1808 = vrcp.f32 %v893_v1  ;;  %v202_v2 = vpop.xlane.xlu1 %201 }
 0x32c   :  { %v203_v3 = vmax.f32 %v202_v2, 1e-12 }
 0x32d   :  { %v1803_v4 = vpop.eup %1802 }
 0x32e   :  { %v523_v6 = vmul.f32 %v1803_v4, %v1795_v43  ;;  %1810 = vrcp.f32 %v203_v3  ;;  %v216_v8 = vpop.xlane.xlu0 %215 }
 0x32f   :  { %v217_v10 = vmax.f32 %v216_v8, 1e-12  ;;  %v209_v11 = vpop.xlane.xlu1 %208  ;;  %v1637_v8 = vld [vmem:[%s2139_s10] ss:$0 sm:$0xff] }
 0x330   :  { %v210_v13 = vmax.f32 %v209_v11, 1e-12  ;;  %1708 = vmatmul.mubr.msk.f32.vlgmr.msra.gmra.mrb[4].mxu0 %vm52_vm1, %v523_v6  ;;  %v1638_v6 = vld [vmem:[%s2138_s11] ss:$0 sm:$0xff] }
 0x331   :  { %v1805_v14 = vpop.eup %1804  ;;  %1812 = vrcp.f32 %v217_v10  ;;  %1716 = vmatpush3.msra.mxu0 %v1981_v34  ;;  %1717 = vmatprep.mubr.msk.f32.mxu0 %vm1823_vm0, %v1822_v0  ;;  %v1632_v34 = vld [vmem:[%s2134_s8 + $0x2] ss:$0 sm:$0xff] }
 0x332   :  { %v1807_v16 = vpop.eup %1806  ;;  %v745_v17 = vmul.f32 %v1805_v14, %v1797_v45  ;;  %1814 = vrcp.f32 %v210_v13  ;;  %1725 = vmatprep.subr.mxu0 %v1822_v0  ;;  %v1135_v24 = vmul.f32 %v1632_v34, %v367_v58 }
 0x333   :  { %v447_v18 = vmul.f32 %v1807_v16, %v1799_v47 }
 0x334   :  { %1718 = vmatmul.mubr.msk.f32.vlgmr.msra.gmra.mrb[6].mxu0 %vm52_vm1, %v745_v17 }
 0x335   :  { %v1809_v20 = vpop.eup %1808  ;;  %1713 = vmatmul.mubr.msk.f32.vlgmr.msra.gmra.mrb[4].mxu1 %vm52_vm1, %v447_v18  ;;  %1726 = vmatpush3.msra.mxu0 %v975_v15 }
 0x336   :  { %v895_v21 = vmul.f32 %v1809_v20, %v1801_v50  ;;  %1721 = vmatpush3.msra.mxu1 %v1984_v35  ;;  %1722 = vmatprep.mubr.msk.f32.mxu1 %vm1823_vm0, %v1822_v0 }
 0x337   :  { %1730 = vmatprep.subr.mxu1 %v1822_v0  ;;  %1727 = vmatprep.mubr.msk.f32.mxu0 %vm1823_vm0, %v1822_v0 }
 0x338   :  { %v1811_v23 = vpop.eup %1810  ;;  %1735 = vmatprep.subr.mxu0 %v1822_v0 }
 0x339   :  { %1723 = vmatmul.mubr.msk.f32.vlgmr.msra.gmra.mrb[6].mxu1 %vm52_vm1, %v895_v21  ;;  %v205_v25 = vmul.f32 %v1811_v23, %v1917_v5 }
 0x33a   :  { %1731 = vmatpush3.msra.mxu1 %v1055_v22  ;;  %1732 = vmatprep.mubr.msk.f32.mxu1 %vm1823_vm0, %v1822_v0 }
 0x33b   :  { %v1813_v35 = vpop.eup %1812  ;;  %1728 = vmatmul.mubr.msk.f32.vlgmr.msra.gmra.mrb[8].mxu0 %vm52_vm1, %v205_v25  ;;  %1778 = vmatprep.subr.bf16.mxu1 %v1825_v7 }
 0x33c   :  { %v1815_v26 = vpop.eup %1814  ;;  %1736 = vmatpush3.msra.mxu0 %v1135_v24  ;;  %1737 = vmatprep.mubr.msk.f32.mxu0 %vm1823_vm0, %v1822_v0  ;;  %v219_v27 = vmul.f32 %v1813_v35, %v1998_v52  ;;  %v1375_v52 = vld [vmem:[%s2136_s12] sm:$0xff] }
 0x33d   :  { %v212_v28 = vmul.f32 %v1815_v26, %v1938_v12  ;;  %1784 = vmatprep.subr.bf16.mxu0 %v1825_v7  ;;  %v1224_v12 = vld [vmem:[%s2135_s9 + $0x8] sm:$0xff]  ;;  %v1785_v36 = vpack.c.bf16 %v1376_v31, %v1375_v52  ;;  %v1642_v31 = vld [vmem:[%s2140_s13] ss:$0 sm:$0xff] }
 0x33e   :  { %v1779_v30 = vpack.c.bf16 %v1224_v12, %v1223_v29 }
 0x33f   :  { %1733 = vmatmul.mubr.msk.f32.vlgmr.msra.gmra.mrb[8].mxu1 %vm52_vm1, %v212_v28  ;;  %1738 = vmatmul.mubr.msk.f32.vlgmr.msra.gmra.mrb[10].mxu0 %vm52_vm1, %v219_v27 }
 0x340   :  { %1748 = vmatprep.mubr.msk.f32.mxu1 %vm1823_vm0, %v1822_v0  ;;  %1759 = vmatprep.mubr.msk.f32.mxu0 %vm1823_vm0, %v1822_v0 }
 0x341   :  { %1780 = vmatpush3.bf16.msra.mxu1 %v1779_v30  ;;  %1786 = vmatpush3.bf16.msra.mxu0 %v1785_v36 }
 0x342   :  { %1781 = vmatprep.subr.bf16.mxu1 %v1825_v7  ;;  %1787 = vmatprep.subr.bf16.mxu0 %v1825_v7 }
 0x345   :  { %1783 = vmatpush3.bf16.msra.mxu1 %v1782_v39  ;;  %1789 = vmatpush3.bf16.msra.mxu0 %v1788_v40 }
 0x346   :  { %1762 = vmatprep.subr.mxu1 %v1822_v0  ;;  %1767 = vmatprep.subr.mxu0 %v1822_v0 }
 0x403   :  { %v593_v41 = vpop.f32.mrb[4].mxu0 }
 0x404   :  { %v1709_v42 = vpop.f32.mrb[5].mxu0 }
 0x407   :  { %v815_v43 = vpop.f32.mrb[6].mxu0 }
 0x408   :  { %v666_v44 = vpop.f32.mrb[4].mxu1  ;;  %v1719_v45 = vpop.f32.mrb[7].mxu0 }
 0x409   :  { %v667_v46 = vadd.f32 %v666_v44, %v593_v41  ;;  %v1714_v47 = vpop.f32.mrb[5].mxu1 }
 0x40b   :  { %v819_v48 = vadd.f32 %v815_v43, %v667_v46 }
 0x40c   :  { %v965_v49 = vpop.f32.mrb[6].mxu1 }
 0x40d   :  { %v969_v50 = vadd.f32 %v965_v49, %v819_v48  ;;  %v1724_v51 = vpop.f32.mrb[7].mxu1 }
 0x40e   :  { %v1045_v53 = vpop.f32.mrb[8].mxu0 }
 0x40f   :  { %v1049_v54 = vadd.f32 %v1045_v53, %v969_v50  ;;  %v1729_v7 = vpop.f32.mrb[9].mxu0 }
 0x412   :  { %v1125_v55 = vpop.f32.mrb[8].mxu1  ;;  %v1205_v56 = vpop.f32.mrb[10].mxu0 }
 0x413   :  { %v1129_v57 = vadd.f32 %v1125_v55, %v1049_v54  ;;  %v1734_v58 = vpop.f32.mrb[9].mxu1  ;;  %v1739_v60 = vpop.f32.mrb[11].mxu0 }
 0x415   :  { %v1209_v62 = vadd.f32 %v1205_v56, %v1129_v57 }
 0x417   :  { %v1217_v63 = vadd.f32 %v1634_v61, %v1209_v62 }
 0x419   :  { %v1219_v1 = vmul.f32 1.442695, %v1217_v63  ;;  %vm1218_vm12 = vcmp.gt.f32.partialorder %v1217_v63, 0.0 }
 0x41b   :  { %1816 = vpow2.f32 %v1219_v1 }
 0x425   :  { %v1817_v2 = vpop.eup %1816 }
 0x426   :  { %v1635_v3 = vadd.f32 -1.0, %v1817_v2 }
 0x428   :  { %v1222_v4 = vsel %vm1218_vm12, %v1217_v63, %v1635_v3 }
 0x429   :  { %1749 = vmatmul.mubr.msk.f32.vlgmr.msra.gmra.mrb[10].mxu1 %vm377_vm4, %v1222_v4  ;;  %1760 = vmatmul.mubr.msk.f32.vlgmr.msra.gmra.mrb[12].mxu0 %vm377_vm4, %v1222_v4 }
 0x42a   :  { %1764 = vmatprep.mubr.msk.f32.mxu1 %vm1823_vm0, %v1822_v0  ;;  %1769 = vmatprep.mubr.msk.f32.mxu0 %vm1823_vm0, %v1822_v0 }
 0x4fc   :  { %v1296_v9 = vpop.f32.mrb[10].mxu1  ;;  %v1445_v10 = vpop.f32.mrb[12].mxu0 }
 0x4fd   :  { %v1750_v11 = vpop.f32.mrb[11].mxu1  ;;  %v1761_v13 = vpop.f32.mrb[13].mxu0  ;;  %1763 = vmatpush3.msra.mxu1 %v1445_v10  ;;  %1768 = vmatpush3.msra.mxu0 %v1296_v9  ;;  %v1319_v14 = vmul.f32 %v1638_v6, %v1296_v9  ;;  %v1307_v15 = vmul.f32 %v1637_v8, %v1296_v9 }
 0x4fe   :  { %1765 = vmatmul.mubr.msk.f32.vlgmr.msra.gmra.mrb[12].mxu1 %vm52_vm1, %v1917_v5 }
 0x4ff   :  { %v1320_v0 = vsel %vm1308_vm13, %v1319_v14, 0.0  ;;  %v1309_v16 = vsel %vm1308_vm13, %v1307_v15, 0.0 }
 0x500   :  { %1321 = vadd.xlane.f32.xlu1 %v1320_v0  ;;  %1310 = vadd.xlane.f32.xlu0 %v1309_v16 }
 0x58d   :  { %v1322_v17 = vpop.xlane.xlu1 %1321  ;;  %v1311_v20 = vpop.xlane.xlu0 %1310 }
 0x58e   :  { %1323 = vxpose.xlu1.b32.start.end [1/1] (short) (narrow) %v1322_v17, 8 }
 0x60e   :  { %v1339_v18 = vpop.trf.xlu1 }
 0x60f   :  { %v1358_v19 = vrot.slane %v1339_v18, %v2000_v59  ;;  %v1515_v59 = vpop.f32.mrb[12].mxu1 }
 0x610   :  { %v1766_v29 = vpop.f32.mrb[13].mxu1 }
 0x611   :  { %v1359_v34 = vadd.f32 %v1358_v19, %v1311_v20 }
 0x613   :  { %vm1360_vm14 = vcmp.ge.f32.partialorder %v1359_v34, 0.0  ;;  %v1361_v21 = vmul.f32 0.2, %v1359_v34 }
 0x615   :  { %v1362_v22 = vsel %vm1360_vm14, %v1359_v34, %v1361_v21 }
 0x616   :  { %v1363_v23 = vsel %vm220_vm8, %v1362_v22, -9e+15 }
 0x617   :  { %v1364_v24 = vsel %vm52_vm1, %v1363_v23, -inf }
 0x618   :  { %1365 = vmax.xlane.f32.xlu0 %v1364_v24 }
 0x6a5   :  { %v1366_v25 = vpop.xlane.xlu0 %1365 }
 0x6a6   :  { %v1367_v35 = vsub.f32 %v1363_v23, %v1366_v25 }
 0x6a8   :  { %v1368_v26 = vmul.f32 1.442695, %v1367_v35 }
 0x6aa   :  { %1818 = vpow2.f32 %v1368_v26 }
 0x6b4   :  { %v1819_v27 = vpop.eup %1818 }
 0x6b5   :  { %v1370_v28 = vsel %vm52_vm1, %v1819_v27, 0.0 }
 0x6b6   :  { %1371 = vadd.xlane.f32.xlu0 %v1370_v28 }
 0x743   :  { %v1372_v12 = vpop.xlane.xlu0 %1371 }
 0x744   :  { %1820 = vrcp.f32 %v1372_v12 }
 0x74e   :  { %v1821_v52 = vpop.eup %1820 }
 0x74f   :  { %v1374_v30 = vmul.f32 %v1821_v52, %v1819_v27 }
 0x751   :  { %1770 = vmatmul.mubr.msk.f32.vlgmr.msra.gmra.mrb[14].mxu0 %vm52_vm1, %v1374_v30 }
 0x824   :  { %v1588_v5 = vpop.f32.mrb[14].mxu0 }
 0x825   :  { %v1589_v32 = vadd.f32 %v1588_v5, %v1515_v59  ;;  %v1771_v33 = vpop.f32.mrb[15].mxu0 }
 0x827   :  { %v1599_v36 = vadd.f32 %v1642_v31, %v1589_v32 }
 0x829   :  { %1600 = vst.msk [vmem:[%s2141_s14] sm:$0xff] %vm1308_vm13, %v1599_v36 }

</bundles_post_ra>
